<compile_context>
chip_gen: v7x
topology: tpu7x:2x2x1
jax: 0.10.0
libtpu: 0.0.40
codegen_flags: <defaults>
</compile_context>

<pallas_src>
import functools

import jax
import jax.numpy as jnp
from jax.experimental import pallas as pl
from jax.experimental.pallas import tpu as pltpu

TM_MAX = 512                      # max row tile (flattened N*H*W)
BN_EPS = 1e-5
VMEM_LIMIT = 32 * 1024 * 1024     # explicit scoped-VMEM limit (ok on v5e..v7x)


# ----------------------------- Pallas kernels -----------------------------

def _apply_act(x, act):
    if act == "relu":
        return jnp.maximum(x, 0.0)
    if act == "relu6":
        return jnp.clip(x, 0.0, 6.0)
    return x


def _mm_kernel(x_ref, w_ref, b_ref, o_ref, *, act):
    # (TM, K)bf16 @ (K, TN)bf16 on the MXU, f32 accumulate, fused bias+act,
    # bf16 store.
    acc = jnp.dot(x_ref[...], w_ref[...], preferred_element_type=jnp.float32)
    acc = acc + b_ref[...]
    o_ref[...] = _apply_act(acc, act).astype(o_ref.dtype)


def _mm_res_kernel(x_ref, w_ref, b_ref, r_ref, o_ref, *, act):
    # Same as _mm_kernel with a fused residual add *before* the activation
    # (MobileNetV2 project uses act='none' -> identical; fused-ASPP uses relu).
    acc = jnp.dot(x_ref[...], w_ref[...], preferred_element_type=jnp.float32)
    acc = acc + b_ref[...] + r_ref[...].astype(jnp.float32)
    o_ref[...] = _apply_act(acc, act).astype(o_ref.dtype)


def _dw_kernel(x_ref, w_ref, b_ref, o_ref, *, act):
    # Depthwise 3x3 on the VPU.  x_ref:(9, TM, TC) bf16 taps (leading-axis tap
    # index keeps each (TM, TC) slice lane/sublane-dense), w_ref:(9, 1, TC) f32.
    acc = jnp.zeros(o_ref.shape, jnp.float32)
    for k in range(9):                   # unrolled; 9 fused multiply-adds
        acc = acc + x_ref[k].astype(jnp.float32) * w_ref[k]
    acc = acc + b_ref[...]
    o_ref[...] = _apply_act(acc, act).astype(o_ref.dtype)


# ------------------------------- call wrappers ------------------------------

def _round_up(x, m):
    return ((x + m - 1) // m) * m


def _pick_tn(n):
    # n <= 512: one full-extent lane block (always layout-legal, weight block
    # stays small since K <= 2880).  Wider channel counts (576 / 960) are
    # tiled 256-wide to match the v6e/v7x 256x256 MXU; Pallas masks the edge.
    return n if n <= 512 else 256


def _split_if_single(grid_m, grid_n, m, tm):
    # v7x shards the "parallel" grid axes over two TensorCores: never emit a
    # 1x1 grid for a non-trivial layer.
    if grid_m * grid_n < 2 and m >= 16:
        return _round_up(pl.cdiv(m, 2), 8)
    return tm


def matmul_bias_act(x, w, b, act, residual=None):
    """act(x @ w + b [+ residual]).  x / w hit the MXU as bf16; bias, residual,
    accumulation and epilogue in f32; output stored as bf16."""
    m, k = x.shape
    n = w.shape[1]

    # Pad K for the K=27 stem conv (zero contribution, keeps lanes tidier).
    if k % 8:
        kp = _round_up(k, 8)
        x = jnp.pad(x, ((0, 0), (0, kp - k)))
        w = jnp.pad(w, ((0, kp - k), (0, 0)))
        k = kp

    # Partial edge blocks are handled by Pallas; only guard the degenerate
    # sub-8-row case (ASPP global-pool branch, M = batch).
    m0 = m
    if m % 8:
        mp = _round_up(m, 8)
        x = jnp.pad(x, ((0, mp - m), (0, 0)))
        if residual is not None:
            residual = jnp.pad(residual, ((0, mp - m), (0, 0)))
        m = mp

    tm = min(TM_MAX, m)
    tn = _pick_tn(n)
    tm = _split_if_single(pl.cdiv(m, tm), pl.cdiv(n, tn), m, tm)
    grid = (pl.cdiv(m, tm), pl.cdiv(n, tn))

    xb = x.astype(jnp.bfloat16)
    wb = w.astype(jnp.bfloat16)
    bb = b.astype(jnp.float32).reshape(1, n)

    in_specs = [
        pl.BlockSpec((tm, k), lambda i, j: (i, 0)),
        pl.BlockSpec((k, tn), lambda i, j: (0, j)),
        pl.BlockSpec((1, tn), lambda i, j: (0, j)),
    ]
    args = [xb, wb, bb]
    res_bytes = 0
    if residual is None:
        kernel = functools.partial(_mm_kernel, act=act)
    else:
        kernel = functools.partial(_mm_res_kernel, act=act)
        in_specs.append(pl.BlockSpec((tm, tn), lambda i, j: (i, j)))
        args.append(residual.astype(jnp.bfloat16))
        res_bytes = m * n * 2

    # TODO(synk): sub-128 output channels (4/16/24/32/48/64/96) still lower to
    # masked stores; carrying 128-multiple channel padding through the net
    # would fix it but blows up activation HBM traffic for the narrow layers.
    out = pl.pallas_call(
        kernel,
        out_shape=jax.ShapeDtypeStruct((m, n), jnp.bfloat16),
        grid=grid,
        in_specs=in_specs,
        out_specs=pl.BlockSpec((tm, tn), lambda i, j: (i, j)),
        compiler_params=pltpu.CompilerParams(
            dimension_semantics=("parallel", "parallel"),
            vmem_limit_bytes=VMEM_LIMIT),
        cost_estimate=pl.CostEstimate(
            flops=2 * m * k * n,
            transcendentals=0,
            bytes_accessed=m * k * 2 + k * n * 2 + m * n * 2 + n * 4 + res_bytes),
    )(*args)
    return out[:m0] if m0 != m else out


def depthwise_bias_act(x9, w, b, act):
    """x9:(9,M,C) bf16 taps, w:(9,C), b:(C,) -> act(sum_k x9[k]*w[k]+b), bf16."""
    _, m, c = x9.shape
    m0 = m
    if m % 8:
        mp = _round_up(m, 8)
        x9 = jnp.pad(x9, ((0, 0), (0, mp - m), (0, 0)))
        m = mp
    tm = min(TM_MAX, m)
    tc = _pick_tn(c)            # channel-tile the wide (576/960) expanded blocks
    tm = _split_if_single(pl.cdiv(m, tm), pl.cdiv(c, tc), m, tm)
    grid = (pl.cdiv(m, tm), pl.cdiv(c, tc))
    out = pl.pallas_call(
        functools.partial(_dw_kernel, act=act),
        out_shape=jax.ShapeDtypeStruct((m, c), jnp.bfloat16),
        grid=grid,
        in_specs=[
            pl.BlockSpec((9, tm, tc), lambda i, j: (0, i, j)),
            pl.BlockSpec((9, 1, tc), lambda i, j: (0, 0, j)),
            pl.BlockSpec((1, tc), lambda i, j: (0, j)),
        ],
        out_specs=pl.BlockSpec((tm, tc), lambda i, j: (i, j)),
        compiler_params=pltpu.CompilerParams(
            dimension_semantics=("parallel", "parallel"),
            vmem_limit_bytes=VMEM_LIMIT),
        cost_estimate=pl.CostEstimate(
            flops=18 * m * c,
            transcendentals=0,
            bytes_accessed=9 * m * c * 2 + m * c * 2 + 9 * c * 4 + c * 4),
    )(x9.astype(jnp.bfloat16),
      w.reshape(9, 1, c).astype(jnp.float32),
      b.reshape(1, c).astype(jnp.float32))
    return out[:m0] if m0 != m else out


# --------------------------- parameters (synthetic) ------------------------

_PARAM_KEY = [jax.random.PRNGKey(42)]


def _winit(shape, scale=0.05):
    _PARAM_KEY[0], sub = jax.random.split(_PARAM_KEY[0])
    return scale * jax.random.normal(sub, shape, jnp.float32)


def _bn_fold(cout):
    # BatchNorm eval with freshly-initialized params/stats.
    gamma = jnp.ones((cout,), jnp.float32)
    beta = jnp.zeros((cout,), jnp.float32)
    mean = jnp.zeros((cout,), jnp.float32)
    var = jnp.ones((cout,), jnp.float32)
    scale = gamma / jnp.sqrt(var + BN_EPS)
    shift = beta - mean * scale
    return scale, shift


# ------------------------------ conv wrappers ------------------------------

def _patches3x3(x, stride, dilation, padding, tap_axis):
    """NHWC -> stacked 3x3 taps (zero padded), bf16.
    tap_axis=0 -> (9, N, Ho, Wo, C);  tap_axis=3 -> (N, Ho, Wo, 9, C)."""
    # TODO(synk): this materializes the activation 9x in HBM (at bf16); a
    # halo-blocked direct-conv kernel would keep the activation read at 1x.
    n, h, w, c = x.shape
    xp = jnp.pad(x, ((0, 0), (padding, padding), (padding, padding), (0, 0)))
    ho = (h + 2 * padding - 2 * dilation - 1) // stride + 1
    wo = (w + 2 * padding - 2 * dilation - 1) // stride + 1
    taps = []
    for ki in range(3):
        for kj in range(3):
            r0 = ki * dilation
            c0 = kj * dilation
            taps.append(xp[:, r0:r0 + stride * (ho - 1) + 1:stride,
                           c0:c0 + stride * (wo - 1) + 1:stride, :])
    return jnp.stack(taps, axis=tap_axis), ho, wo


def conv1x1_layer(x, cout, act, conv_bias, bn=True, residual=None):
    cin = x.shape[-1]
    w = _winit((cin, cout))
    b = _winit((cout,)) if conv_bias else jnp.zeros((cout,), jnp.float32)
    if bn:
        scale, shift = _bn_fold(cout)
        w = w * scale[None, :]
        b = b * scale + shift
    n, h, ww, _ = x.shape
    res = None if residual is None else residual.reshape(-1, cout)
    y = matmul_bias_act(x.reshape(-1, cin), w, b, act, residual=res)
    return y.reshape(n, h, ww, cout)


def conv3x3_layer(x, cout, act, stride, dilation, padding, conv_bias, bn=True):
    cin = x.shape[-1]
    w = _winit((9 * cin, cout))          # layout: ((tap, cin) row-major, cout)
    b = _winit((cout,)) if conv_bias else jnp.zeros((cout,), jnp.float32)
    if bn:
        scale, shift = _bn_fold(cout)
        w = w * scale[None, :]
        b = b * scale + shift
    patches, ho, wo = _patches3x3(x.astype(jnp.bfloat16), stride, dilation,
                                  padding, tap_axis=3)
    n = x.shape[0]
    cols = patches.reshape(n * ho * wo, 9 * cin)
    y = matmul_bias_act(cols, w, b, act)
    return y.reshape(n, ho, wo, cout)


def dwconv3x3_layer(x, act, stride, dilation, padding):
    c = x.shape[-1]
    w = _winit((9, c))
    scale, shift = _bn_fold(c)
    w = w * scale[None, :]
    b = shift
    patches, ho, wo = _patches3x3(x.astype(jnp.bfloat16), stride, dilation,
                                  padding, tap_axis=0)
    n = x.shape[0]
    x9 = patches.reshape(9, n * ho * wo, c)
    y = depthwise_bias_act(x9, w, b, act)
    return y.reshape(n, ho, wo, c)


def bilinear_ac(x, oh, ow):
    """Bilinear resize, align_corners=True (matches F.interpolate)."""
    n, h, w, c = x.shape

    def coords(size_in, size_out):
        if size_out == 1 or size_in == 1:
            return jnp.zeros((size_out,), jnp.float32)
        return jnp.linspace(0.0, float(size_in - 1), size_out)

    hs, ws = coords(h, oh), coords(w, ow)
    h0 = jnp.clip(jnp.floor(hs), 0, h - 1).astype(jnp.int32)
    h1 = jnp.minimum(h0 + 1, h - 1)
    th = (hs - h0.astype(jnp.float32)).reshape(1, oh, 1, 1)
    w0 = jnp.clip(jnp.floor(ws), 0, w - 1).astype(jnp.int32)
    w1 = jnp.minimum(w0 + 1, w - 1)
    tw = (ws - w0.astype(jnp.float32)).reshape(1, 1, ow, 1)
    r0 = jnp.take(x, h0, axis=1)
    r1 = jnp.take(x, h1, axis=1)
    top = jnp.take(r0, w0, axis=2) * (1 - tw) + jnp.take(r0, w1, axis=2) * tw
    bot = jnp.take(r1, w0, axis=2) * (1 - tw) + jnp.take(r1, w1, axis=2) * tw
    return top * (1 - th) + bot * th


# --------------------------- MobileNetV2 backbone ---------------------------

IR_SETTINGS = [  # (expand t, out c, repeats n, stride s)
    (1, 16, 1, 1), (6, 24, 2, 2), (6, 32, 3, 2), (6, 64, 4, 2),
    (6, 96, 3, 1), (6, 160, 3, 2), (6, 320, 1, 1),
]


def _backbone_blocks(downsample_factor=8):
    blocks, in_ch, idx = [], 32, 1
    for t, c, n, s in IR_SETTINGS:
        for i in range(n):
            stride = s if i == 0 else 1
            blk = dict(idx=idx, inp=in_ch, oup=c, stride=stride, expand=t,
                       dw_stride=stride, dw_dil=1, dw_pad=1)
            dilate = 0
            if downsample_factor == 8:           # DeepLab `_nostride_dilate`
                if 7 <= idx < 14:
                    dilate = 2
                elif idx >= 14:
                    dilate = 4
            if dilate:
                if stride == 2:
                    blk["dw_stride"], blk["dw_dil"], blk["dw_pad"] = 1, dilate // 2, dilate // 2
                else:
                    blk["dw_dil"], blk["dw_pad"] = dilate, dilate
            blocks.append(blk)
            in_ch = c
            idx += 1
    return blocks


def inverted_residual(x, blk):
    inp, oup, expand = blk["inp"], blk["oup"], blk["expand"]
    use_res = (blk["stride"] == 1 and inp == oup)
    h = x
    if expand != 1:
        h = conv1x1_layer(h, inp * expand, act="relu6", conv_bias=False)
    h = dwconv3x3_layer(h, act="relu6", stride=blk["dw_stride"],
                        dilation=blk["dw_dil"], padding=blk["dw_pad"])
    # Project 1x1; the residual add is fused into the matmul epilogue
    # (act='none', so pre/post-activation ordering is equivalent).
    # TODO(synk): fuse the whole expand->dw->project block into one pallas_call
    # keeping the expanded intermediate in VMEM (biggest remaining launch win).
    return conv1x1_layer(h, oup, act="none", conv_bias=False,
                         residual=x if use_res else None)


def mobilenetv2_backbone(x, downsample_factor=8):
    # features[0]: 3x3 s2 conv 3->32 + BN + ReLU6
    x = conv3x3_layer(x, 32, act="relu6", stride=2, dilation=1, padding=1,
                      conv_bias=False)
    low = None
    for blk in _backbone_blocks(downsample_factor):
        x = inverted_residual(x, blk)
        if blk["idx"] == 3:          # low_level_features = features[:4](x)
            low = x                  # 24 channels, stride 4
    return low, x                    # deep: 320 channels, stride 8


# --------------------------------- ASPP ------------------------------------

def aspp(x, dim_out=256, rate=2):
    n, h, w, cin = x.shape
    b1 = conv1x1_layer(x, dim_out, act="relu", conv_bias=True)
    b2 = conv3x3_layer(x, dim_out, act="relu", stride=1, dilation=6 * rate,
                       padding=6 * rate, conv_bias=True)
    b3 = conv3x3_layer(x, dim_out, act="relu", stride=1, dilation=12 * rate,
                       padding=12 * rate, conv_bias=True)
    b4 = conv3x3_layer(x, dim_out, act="relu", stride=1, dilation=18 * rate,
                       padding=18 * rate, conv_bias=True)

    # Global-pool branch: 1x1 conv + BN + ReLU on the pooled feature.
    gf = jnp.mean(x.astype(jnp.float32), axis=(1, 2), keepdims=True)
    gf = conv1x1_layer(gf, dim_out, act="relu", conv_bias=True)     # (n,1,1,256)

    # conv_cat (1x1, K = 5*dim_out) with BN folded.  The global branch is
    # spatially constant, so its contribution gf @ W_cat[4*dim_out:] is fused
    # into the projection epilogue as a per-image residual (added before the
    # ReLU) instead of broadcast_to + concat.
    k_cat = 5 * dim_out
    w_cat = _winit((k_cat, dim_out))
    b_cat = _winit((dim_out,))
    scale, shift = _bn_fold(dim_out)
    w_cat = w_cat * scale[None, :]
    b_cat = b_cat * scale + shift

    v = jnp.dot(gf.reshape(n, dim_out).astype(jnp.float32),
                w_cat[4 * dim_out:]).astype(jnp.bfloat16)           # (n, 256)
    res = jnp.broadcast_to(v.reshape(n, 1, 1, dim_out), (n, h, w, dim_out))

    cat = jnp.concatenate([b1, b2, b3, b4], axis=-1)                # (n,h,w,1024)
    out = matmul_bias_act(cat.reshape(-1, 4 * dim_out), w_cat[:4 * dim_out],
                          b_cat, act="relu",
                          residual=res.reshape(-1, dim_out))
    return out.reshape(n, h, w, dim_out)


# ------------------------- DeepLab head / generator -------------------------

def generator_forward(x_nchw, num_classes=4, downsample_factor=8):
    x = jnp.transpose(x_nchw, (0, 2, 3, 1)).astype(jnp.float32)   # NCHW -> NHWC
    h, w = x.shape[1], x.shape[2]

    low, deep = mobilenetv2_backbone(x, downsample_factor)
    feat = aspp(deep, 256, rate=16 // downsample_factor)

    low = conv1x1_layer(low, 48, act="relu", conv_bias=True)       # shortcut_conv
    feat = bilinear_ac(feat, low.shape[1], low.shape[2]).astype(jnp.bfloat16)
    feat = jnp.concatenate([feat, low], axis=-1)                   # 304 ch, bf16

    feat = conv3x3_layer(feat, 256, act="relu", stride=1, dilation=1,
                         padding=1, conv_bias=True)
    # TODO(synk): nn.Dropout(0.5) — identity under eval-mode semantics.
    feat = conv3x3_layer(feat, 256, act="relu", stride=1, dilation=1,
                         padding=1, conv_bias=True)
    # TODO(synk): nn.Dropout(0.1) — identity under eval-mode semantics.

    feat = conv1x1_layer(feat, num_classes, act="none", conv_bias=True,
                         bn=False)                                  # cls_conv
    feat = bilinear_ac(feat, h, w)                                  # f32 out
    return jnp.transpose(feat, (0, 3, 1, 2))                        # NCHW out


if __name__ == "__main__":
    key = jax.random.PRNGKey(0)
    x = jax.random.normal(key, (2, 3, 32, 32), jnp.float32)   # NCHW, like PyTorch
    out = generator_forward(x, num_classes=4, downsample_factor=8)
    out = jax.block_until_ready(out)
    assert out.shape == (2, 4, 32, 32), out.shape
    assert bool(jnp.all(jnp.isfinite(out)))
    print("KERNEL_OK")
</pallas_src>

<mosaic_0001>
module attributes {stable_mosaic.version = 11 : i64} {
  func.func @_mm_kernel(%arg0: i32, %arg1: i32, %arg2: memref<256x32xbf16, #tpu.memory_space<vmem>>, %arg3: memref<32x32xbf16, #tpu.memory_space<vmem>>, %arg4: memref<1x32xf32, #tpu.memory_space<vmem>>, %arg5: memref<256x32xbf16, #tpu.memory_space<vmem>>) attributes {dimension_semantics = [#tpu.dimension_semantics<parallel>, #tpu.dimension_semantics<parallel>], iteration_bounds = array<i64: 2, 1>, scalar_prefetch = 0 : i64, scratch_operands = 0 : i64, tpu.core_type = #tpu.core_type<tc>, window_params = [{transform_indices = @transform_0, window_bounds = array<i64: 256, 32>}, {transform_indices = @transform_1, window_bounds = array<i64: 32, 32>}, {transform_indices = @transform_2, window_bounds = array<i64: 1, 32>}, {transform_indices = @transform_3, window_bounds = array<i64: 256, 32>}]} {
    %c0 = arith.constant 0 : index
    %c0_0 = arith.constant 0 : index
    %0 = vector.load %arg2[%c0, %c0_0] : memref<256x32xbf16, #tpu.memory_space<vmem>>, vector<256x32xbf16>
    %c0_1 = arith.constant 0 : index
    %c0_2 = arith.constant 0 : index
    %1 = vector.load %arg3[%c0_1, %c0_2] : memref<32x32xbf16, #tpu.memory_space<vmem>>, vector<32x32xbf16>
    %cst = arith.constant dense<0.000000e+00> : vector<256x32xf32>
    %2 = tpu.matmul %0, %1, %cst {dimension_numbers = #tpu.dot_dimension_numbers<[1], [0], [0], [1], [0, 0, 1, 1], [], []>} : vector<256x32xbf16>, vector<32x32xbf16>, vector<256x32xf32> -> vector<256x32xf32>
    %c0_3 = arith.constant 0 : index
    %c0_4 = arith.constant 0 : index
    %3 = vector.load %arg4[%c0_3, %c0_4] : memref<1x32xf32, #tpu.memory_space<vmem>>, vector<1x32xf32>
    %4 = vector.broadcast %3 : vector<1x32xf32> to vector<256x32xf32>
    %5 = arith.addf %2, %4 : vector<256x32xf32>
    %cst_5 = arith.constant 0.000000e+00 : f32
    %cst_6 = arith.constant 6.000000e+00 : f32
    %6 = vector.broadcast %cst_5 : f32 to vector<256x32xf32>
    %7 = arith.maximumf %6, %5 : vector<256x32xf32>
    %8 = vector.broadcast %cst_6 : f32 to vector<256x32xf32>
    %9 = arith.minimumf %8, %7 : vector<256x32xf32>
    %10 = arith.truncf %9 : vector<256x32xf32> to vector<256x32xbf16>
    %c0_7 = arith.constant 0 : index
    %c0_8 = arith.constant 0 : index
    %11 = vector.load %arg5[%c0_7, %c0_8] : memref<256x32xbf16, #tpu.memory_space<vmem>>, vector<256x32xbf16>
    tpu.vector_store %arg5[%c0_7, %c0_8], %10 {strides = array<i32>} : memref<256x32xbf16, #tpu.memory_space<vmem>>, vector<256x32xbf16>,
    return
  }
  func.func @transform_0(%arg0: i32, %arg1: i32) -> (i32, i32) {
    %c0_i32 = arith.constant 0 : i32
    %c0_i32_0 = arith.constant 0 : i32
    return %arg0, %c0_i32 : i32, i32
  }
  func.func @transform_1(%arg0: i32, %arg1: i32) -> (i32, i32) {
    %c0_i32 = arith.constant 0 : i32
    %c0_i32_0 = arith.constant 0 : i32
    return %c0_i32, %arg1 : i32, i32
  }
  func.func @transform_2(%arg0: i32, %arg1: i32) -> (i32, i32) {
    %c0_i32 = arith.constant 0 : i32
    %c0_i32_0 = arith.constant 0 : i32
    return %c0_i32, %arg1 : i32, i32
  }
  func.func @transform_3(%arg0: i32, %arg1: i32) -> (i32, i32) {
    %c0_i32 = arith.constant 0 : i32
    return %arg0, %arg1 : i32, i32
  }
}

</mosaic_0001>

<bundles_post_ra>
// kernel: tpu_custom_call.1
= control target key start
LH: loop header
LB: loop body
LE: loop exit
PB: predicated region body
PF: predicated region fallthrough
CT: control target
= control target key end

     0   :  { %s1154_s12 = smov 0   ;;  %s1156_s13 = smov 0   ;;  %s1337_s0 = inlined_call_operand.vmem [shape: bf16[512,32], index: 0, kind: input, shape index: {}]   ;;  %s1338_s1 = inlined_call_operand.vmem [shape: bf16[32,32], index: 1, kind: input, shape index: {}]   ;;  %s1339_s2 = inlined_call_operand.vmem [shape: f32[1,32], index: 2, kind: input, shape index: {}]   ;;  %s1340_s3 = inlined_call_operand.vmem [shape: bf16[512,32], index: 3, kind: output, shape index: {}]  }
   0x1   :  { %s1158_s14 = smov 0  }
   0x2 LB: > { %s25_s15 = sadd.s32 1, %s1128_s13  ;;  %p904_p0 = scmp.ge.s32.totalorder %s1132_s14, 1  ;;  %s1132_s14 = sphi %s1158_s14, %s13_s14   ;;  %s1128_s13 = sphi %s1156_s13, %s1342_s13   ;;  %s1124_s12 = sphi %s1154_s12, %s1341_s12  }
   0x3   : > { %p27_p1 = scmp.ge.s32.totalorder %s25_s15, 2  ;;  %p169_p2 = scmp.lt.s32.totalorder %s1132_s14, 3 }
   0x5   : > { %s1344_s15 = smov (%p27_p1, %s25_s15), 0  ;;  %p170_p3 = pnand %p904_p0, %p169_p2 }
   0x6   : > { %v1092_v0 = vld [vmem:[%s1338_s1] sm:$0xff] (!%p170_p3)   ;;  %s905_s18 = sshll.u32 (!%p170_p3), %s1124_s12, 5  ;;  %v1093_v1 = vld [vmem:[%s1338_s1 + $0x8] sm:$0xff] (!%p170_p3)   ;;  %vm361_vm0 = vcmask (!%p170_p3), 261120   ;;  %vm763_vm1 = vcmask (!%p170_p3), 257024  }
   0x7   : > { %173 = sbr.rel (%p170_p3) target bundleno = 269 (0x10d), region = 32  ;;  %p204_p4 = scmp.lt.s32.totalorder (!%p170_p3), %s905_s18, 63  ;;  %1028 = vmatprep.subr.bf16.mxu0 (!%p170_p3), %v1092_v0  ;;  %1064 = vmatprep.subr.bf16.mxu1 (!%p170_p3), %v1092_v0  ;;  %v1223_v18 = vld [vmem:[%s1339_s2] ss:$0 sm:$0xff] (!%p170_p3) }
   0x8   : > { %1029 = vmatpush3.bf16.msra.mxu0 (!%p170_p3), %v1092_v0  ;;  %1066 = vmatpush3.bf16.msra.mxu1 (!%p170_p3), %v1092_v0 }
   0x9   : > { %1030 = vmatprep.subr.bf16.mxu0 (!%p170_p3), %v1093_v1  ;;  %1065 = vmatprep.subr.bf16.mxu1 (!%p170_p3), %v1093_v1 }
   0xc   : > { %1031 = vmatpush3.bf16.msra.mxu0 (!%p170_p3), %v1093_v1  ;;  %1067 = vmatpush3.bf16.msra.mxu1 (!%p170_p3), %v1093_v1 }
   0xe   : > { %s1346_s18 = smov (!%p204_p4, %s905_s18), 63 }
   0xf   : > { %s906_s21 = sshll.u32 %s1346_s18, 2 }
  0x10   : > { %s1186_s24 = scalar_lea.vmem %s1337_s0, %s906_s21  ;;  %s1238_s29 = scalar_lea.vmem %s1340_s3, %s906_s21 }
  0x11   : > { %v1094_v2 = vld [vmem:[%s1186_s24] sm:$0xff]   ;;  %v1096_v4 = vld [vmem:[%s1186_s24 + $0x8] sm:$0xff]   ;;  %v1098_v6 = vld [vmem:[%s1186_s24 + $0x10] sm:$0xff]  }
  0x12   : > { %v1095_v3 = vld [vmem:[%s1186_s24 + $0x40] sm:$0xff]   ;;  %1032 = vmatprep.mubr.msk.bf16.mxu0 %vm361_vm0, %v1094_v2  ;;  %v1097_v5 = vld [vmem:[%s1186_s24 + $0x48] sm:$0xff]   ;;  %v1099_v7 = vld [vmem:[%s1186_s24 + $0x50] sm:$0xff]  }
  0x13   : > { %1048 = vmatprep.mubr.msk.bf16.mxu1 %vm361_vm0, %v1095_v3  ;;  %1033 = vmatmul.mubr.msk.bf16.vlgmr.msra.gmra.mrb[0].mxu0 %vm361_vm0, %v1096_v4  ;;  %v1100_v8 = vld [vmem:[%s1186_s24 + $0x18] sm:$0xff]   ;;  %v1102_v10 = vld [vmem:[%s1186_s24 + $0x20] sm:$0xff]   ;;  %v1104_v12 = vld [vmem:[%s1186_s24 + $0x28] sm:$0xff]  }
  0x14   : > { %1049 = vmatmul.mubr.msk.bf16.vlgmr.msra.gmra.mrb[0].mxu1 %vm361_vm0, %v1097_v5  ;;  %1036 = vmatprep.mubr.msk.bf16.mxu0 %vm361_vm0, %v1098_v6  ;;  %v1101_v9 = vld [vmem:[%s1186_s24 + $0x58] sm:$0xff]   ;;  %v1103_v11 = vld [vmem:[%s1186_s24 + $0x60] sm:$0xff]   ;;  %v1105_v13 = vld [vmem:[%s1186_s24 + $0x68] sm:$0xff]  }
  0x15   : > { %1052 = vmatprep.mubr.msk.bf16.mxu1 %vm361_vm0, %v1099_v7  ;;  %v1106_v14 = vld [vmem:[%s1186_s24 + $0x30] sm:$0xff]   ;;  %v1108_v16 = vld [vmem:[%s1186_s24 + $0x38] sm:$0xff]  }
  0x16   : > { %v1107_v15 = vld [vmem:[%s1186_s24 + $0x70] sm:$0xff]   ;;  %v1109_v17 = vld [vmem:[%s1186_s24 + $0x78] sm:$0xff]  }
  0x1b   : > { %1037 = vmatmul.mubr.msk.bf16.gmra.mrb[4].mxu0 %vm361_vm0, %v1100_v8 }
  0x1c   : > { %1053 = vmatmul.mubr.msk.bf16.gmra.mrb[4].mxu1 %vm361_vm0, %v1101_v9  ;;  %1040 = vmatprep.mubr.msk.bf16.mxu0 %vm361_vm0, %v1102_v10 }
  0x1d   : > { %1056 = vmatprep.mubr.msk.bf16.mxu1 %vm361_vm0, %v1103_v11 }
  0x23   : > { %1041 = vmatmul.mubr.msk.bf16.gmra.mrb[8].mxu0 %vm361_vm0, %v1104_v12 }
  0x24   : > { %1057 = vmatmul.mubr.msk.bf16.gmra.mrb[8].mxu1 %vm361_vm0, %v1105_v13  ;;  %1044 = vmatprep.mubr.msk.bf16.mxu0 %vm361_vm0, %v1106_v14 }
  0x25   : > { %1060 = vmatprep.mubr.msk.bf16.mxu1 %vm361_vm0, %v1107_v15 }
  0x2b   : > { %1045 = vmatmul.mubr.msk.bf16.gmra.mrb[12].mxu0 %vm361_vm0, %v1108_v16 }
  0x2c   : > { %1061 = vmatmul.mubr.msk.bf16.gmra.mrb[12].mxu1 %vm361_vm0, %v1109_v17 }
  0xe6   : > { %v1034_v19 = vpop.f32.mrb[0].mxu0 }
  0xe7   : > { %v453_v20 = vadd.f32 %v1034_v19, %v1223_v18  ;;  %v1050_v21 = vpop.f32.mrb[0].mxu1  ;;  %v444_v22 = vpop.f32.mrb[1].mxu0 }
  0xe8   : > { %v517_v23 = vadd.f32 %v1050_v21, %v1223_v18  ;;  %v445_v24 = vadd.f32 %v1223_v18, %v444_v22  ;;  %v508_v25 = vpop.f32.mrb[1].mxu1  ;;  %v1035_v26 = vpop.f32.mrb[2].mxu0 }
  0xe9   : > { %v573_v27 = vmax.f32 %v453_v20, 0.0  ;;  %v509_v28 = vadd.f32 %v1223_v18, %v508_v25  ;;  %v456_v29 = vadd.f32 %v1035_v26, %v1223_v18  ;;  %v1051_v30 = vpop.f32.mrb[2].mxu1  ;;  %v447_v31 = vpop.f32.mrb[3].mxu0 }
  0xea   : > { %v589_v32 = vmax.f32 %v517_v23, 0.0  ;;  %v571_v33 = vmax.f32 %v445_v24, 0.0  ;;  %v520_v34 = vadd.f32 %v1051_v30, %v1223_v18  ;;  %v448_v35 = vadd.f32 %v1223_v18, %v447_v31  ;;  %v511_v36 = vpop.f32.mrb[3].mxu1 }
  0xeb   : > { %v605_v37 = vmin.f32 %v573_v27, 6.0  ;;  %v587_v38 = vmax.f32 %v509_v28, 0.0  ;;  %v574_v39 = vmax.f32 %v456_v29, 0.0  ;;  %v512_v40 = vadd.f32 %v1223_v18, %v511_v36 }
  0xec   : > { %v621_v41 = vmin.f32 %v589_v32, 6.0  ;;  %v603_v42 = vmin.f32 %v571_v33, 6.0  ;;  %v590_v43 = vmax.f32 %v520_v34, 0.0  ;;  %v572_v44 = vmax.f32 %v448_v35, 0.0 }
  0xed   : > { %v980_v45 = vpack.c.bf16 %v605_v37, %v605_v37  ;;  %v619_v46 = vmin.f32 %v587_v38, 6.0  ;;  %v606_v47 = vmin.f32 %v574_v39, 6.0  ;;  %v588_v48 = vmax.f32 %v512_v40, 0.0 }
  0xee   : > { %v996_v49 = vpack.c.bf16 %v621_v41, %v621_v41  ;;  %v978_v50 = vpack.c.bf16 %v603_v42, %v603_v42  ;;  %v622_v51 = vmin.f32 %v590_v43, 6.0  ;;  %v604_v52 = vmin.f32 %v572_v44, 6.0  ;;  %v1038_v53 = vpop.f32.mrb[4].mxu0 }
  0xef   : > { %766 = vst.msk [vmem:[%s1238_s29 + $0x8] sm:$0xf] %vm763_vm1, %v980_v45  ;;  %v994_v54 = vpack.c.bf16 %v619_v46, %v619_v46  ;;  %v981_v55 = vpack.c.bf16 %v606_v47, %v606_v47  ;;  %v620_v56 = vmin.f32 %v588_v48, 6.0  ;;  %v469_v57 = vadd.f32 %v1038_v53, %v1223_v18  ;;  %v1054_v58 = vpop.f32.mrb[4].mxu1  ;;  %v460_v59 = vpop.f32.mrb[5].mxu0 }
  0xf0   : > { %782 = vst.msk [vmem:[%s1238_s29 + $0x48] sm:$0xf] %vm763_vm1, %v996_v49  ;;  %764 = vst.msk [vmem:[%s1238_s29] sm:$0xf] %vm763_vm1, %v978_v50  ;;  %v997_v60 = vpack.c.bf16 %v622_v51, %v622_v51  ;;  %v979_v61 = vpack.c.bf16 %v604_v52, %v604_v52  ;;  %v533_v62 = vadd.f32 %v1054_v58, %v1223_v18  ;;  %v524_v0 = vpop.f32.mrb[5].mxu1  ;;  %v1039_v1 = vpop.f32.mrb[6].mxu0 }
  0xf1   : > { %v461_v63 = vadd.f32 %v1223_v18, %v460_v59  ;;  %780 = vst.msk [vmem:[%s1238_s29 + $0x40] sm:$0xf] %vm763_vm1, %v994_v54  ;;  %767 = vst.msk [vmem:[%s1238_s29 + $0xc] sm:$0xf] %vm763_vm1, %v981_v55  ;;  %v995_v2 = vpack.c.bf16 %v620_v56, %v620_v56  ;;  %v577_v3 = vmax.f32 %v469_v57, 0.0  ;;  %v525_v4 = vadd.f32 %v1223_v18, %v524_v0  ;;  %v1055_v6 = vpop.f32.mrb[6].mxu1 }
  0xf2   : > { %v472_v5 = vadd.f32 %v1039_v1, %v1223_v18  ;;  %v463_v7 = vpop.f32.mrb[7].mxu0  ;;  %783 = vst.msk [vmem:[%s1238_s29 + $0x4c] sm:$0xf] %vm763_vm1, %v997_v60  ;;  %765 = vst.msk [vmem:[%s1238_s29 + $0x4] sm:$0xf] %vm763_vm1, %v979_v61  ;;  %v593_v8 = vmax.f32 %v533_v62, 0.0  ;;  %v536_v10 = vadd.f32 %v1055_v6, %v1223_v18 }
  0xf3   : > { %v575_v9 = vmax.f32 %v461_v63, 0.0  ;;  %v464_v11 = vadd.f32 %v1223_v18, %v463_v7  ;;  %v527_v12 = vpop.f32.mrb[7].mxu1  ;;  %781 = vst.msk [vmem:[%s1238_s29 + $0x44] sm:$0xf] %vm763_vm1, %v995_v2  ;;  %v609_v13 = vmin.f32 %v577_v3, 6.0  ;;  %v591_v14 = vmax.f32 %v525_v4, 0.0 }
  0xf4   : > { %v578_v15 = vmax.f32 %v472_v5, 0.0  ;;  %v528_v16 = vadd.f32 %v1223_v18, %v527_v12  ;;  %v625_v17 = vmin.f32 %v593_v8, 6.0  ;;  %v594_v20 = vmax.f32 %v536_v10, 0.0 }
  0xf5   : > { %v607_v19 = vmin.f32 %v575_v9, 6.0  ;;  %v576_v21 = vmax.f32 %v464_v11, 0.0  ;;  %v984_v22 = vpack.c.bf16 %v609_v13, %v609_v13  ;;  %v623_v23 = vmin.f32 %v591_v14, 6.0 }
  0xf6   : > { %v610_v24 = vmin.f32 %v578_v15, 6.0  ;;  %v592_v25 = vmax.f32 %v528_v16, 0.0  ;;  %v1000_v26 = vpack.c.bf16 %v625_v17, %v625_v17  ;;  %v626_v28 = vmin.f32 %v594_v20, 6.0  ;;  %v1042_v30 = vpop.f32.mrb[8].mxu0 }
  0xf7   : > { %v982_v27 = vpack.c.bf16 %v607_v19, %v607_v19  ;;  %v608_v29 = vmin.f32 %v576_v21, 6.0  ;;  %770 = vst.msk [vmem:[%s1238_s29 + $0x18] sm:$0xf] %vm763_vm1, %v984_v22  ;;  %v998_v31 = vpack.c.bf16 %v623_v23, %v623_v23  ;;  %v485_v34 = vadd.f32 %v1042_v30, %v1223_v18  ;;  %v1058_v35 = vpop.f32.mrb[8].mxu1  ;;  %v476_v36 = vpop.f32.mrb[9].mxu0 }
  0xf8   : > { %v985_v32 = vpack.c.bf16 %v610_v24, %v610_v24  ;;  %v624_v33 = vmin.f32 %v592_v25, 6.0  ;;  %786 = vst.msk [vmem:[%s1238_s29 + $0x58] sm:$0xf] %vm763_vm1, %v1000_v26  ;;  %v1001_v37 = vpack.c.bf16 %v626_v28, %v626_v28  ;;  %v549_v39 = vadd.f32 %v1058_v35, %v1223_v18  ;;  %v540_v41 = vpop.f32.mrb[9].mxu1  ;;  %v1043_v42 = vpop.f32.mrb[10].mxu0 }
  0xf9   : > { %768 = vst.msk [vmem:[%s1238_s29 + $0x10] sm:$0xf] %vm763_vm1, %v982_v27  ;;  %v983_v38 = vpack.c.bf16 %v608_v29, %v608_v29  ;;  %v477_v40 = vadd.f32 %v1223_v18, %v476_v36  ;;  %784 = vst.msk [vmem:[%s1238_s29 + $0x50] sm:$0xf] %vm763_vm1, %v998_v31  ;;  %v581_v44 = vmax.f32 %v485_v34, 0.0  ;;  %v541_v45 = vadd.f32 %v1223_v18, %v540_v41  ;;  %v1059_v47 = vpop.f32.mrb[10].mxu1 }
  0xfa   : > { %771 = vst.msk [vmem:[%s1238_s29 + $0x1c] sm:$0xf] %vm763_vm1, %v985_v32  ;;  %v999_v43 = vpack.c.bf16 %v624_v33, %v624_v33  ;;  %v488_v46 = vadd.f32 %v1043_v42, %v1223_v18  ;;  %v479_v48 = vpop.f32.mrb[11].mxu0  ;;  %787 = vst.msk [vmem:[%s1238_s29 + $0x5c] sm:$0xf] %vm763_vm1, %v1001_v37  ;;  %v597_v49 = vmax.f32 %v549_v39, 0.0  ;;  %v552_v51 = vadd.f32 %v1059_v47, %v1223_v18 }
  0xfb   : > { %769 = vst.msk [vmem:[%s1238_s29 + $0x14] sm:$0xf] %vm763_vm1, %v983_v38  ;;  %v579_v50 = vmax.f32 %v477_v40, 0.0  ;;  %v480_v52 = vadd.f32 %v1223_v18, %v479_v48  ;;  %v543_v53 = vpop.f32.mrb[11].mxu1  ;;  %v613_v54 = vmin.f32 %v581_v44, 6.0  ;;  %v595_v55 = vmax.f32 %v541_v45, 0.0 }
  0xfc   : > { %785 = vst.msk [vmem:[%s1238_s29 + $0x54] sm:$0xf] %vm763_vm1, %v999_v43  ;;  %v582_v56 = vmax.f32 %v488_v46, 0.0  ;;  %v544_v57 = vadd.f32 %v1223_v18, %v543_v53  ;;  %v629_v58 = vmin.f32 %v597_v49, 6.0  ;;  %v598_v60 = vmax.f32 %v552_v51, 0.0 }
  0xfd   : > { %v611_v59 = vmin.f32 %v579_v50, 6.0  ;;  %v580_v61 = vmax.f32 %v480_v52, 0.0  ;;  %v988_v62 = vpack.c.bf16 %v613_v54, %v613_v54  ;;  %v627_v63 = vmin.f32 %v595_v55, 6.0 }
  0xfe   : > { %v614_v0 = vmin.f32 %v582_v56, 6.0  ;;  %v596_v1 = vmax.f32 %v544_v57, 0.0  ;;  %v1004_v2 = vpack.c.bf16 %v629_v58, %v629_v58  ;;  %v630_v4 = vmin.f32 %v598_v60, 6.0  ;;  %v1046_v6 = vpop.f32.mrb[12].mxu0 }
  0xff   : > { %v986_v3 = vpack.c.bf16 %v611_v59, %v611_v59  ;;  %v612_v5 = vmin.f32 %v580_v61, 6.0  ;;  %774 = vst.msk [vmem:[%s1238_s29 + $0x28] sm:$0xf] %vm763_vm1, %v988_v62  ;;  %v1002_v7 = vpack.c.bf16 %v627_v63, %v627_v63  ;;  %v501_v10 = vadd.f32 %v1046_v6, %v1223_v18  ;;  %v1062_v11 = vpop.f32.mrb[12].mxu1  ;;  %v492_v12 = vpop.f32.mrb[13].mxu0 }
 0x100   : > { %v989_v8 = vpack.c.bf16 %v614_v0, %v614_v0  ;;  %v628_v9 = vmin.f32 %v596_v1, 6.0  ;;  %790 = vst.msk [vmem:[%s1238_s29 + $0x68] sm:$0xf] %vm763_vm1, %v1004_v2  ;;  %v1005_v13 = vpack.c.bf16 %v630_v4, %v630_v4  ;;  %v565_v15 = vadd.f32 %v1062_v11, %v1223_v18  ;;  %v556_v17 = vpop.f32.mrb[13].mxu1  ;;  %v1047_v19 = vpop.f32.mrb[14].mxu0 }
 0x101   : > { %772 = vst.msk [vmem:[%s1238_s29 + $0x20] sm:$0xf] %vm763_vm1, %v986_v3  ;;  %v987_v14 = vpack.c.bf16 %v612_v5, %v612_v5  ;;  %v493_v16 = vadd.f32 %v1223_v18, %v492_v12  ;;  %788 = vst.msk [vmem:[%s1238_s29 + $0x60] sm:$0xf] %vm763_vm1, %v1002_v7  ;;  %v585_v21 = vmax.f32 %v501_v10, 0.0  ;;  %v557_v22 = vadd.f32 %v1223_v18, %v556_v17  ;;  %v1063_v24 = vpop.f32.mrb[14].mxu1 }
 0x102   : > { %775 = vst.msk [vmem:[%s1238_s29 + $0x2c] sm:$0xf] %vm763_vm1, %v989_v8  ;;  %v1003_v20 = vpack.c.bf16 %v628_v9, %v628_v9  ;;  %v504_v23 = vadd.f32 %v1047_v19, %v1223_v18  ;;  %v495_v25 = vpop.f32.mrb[15].mxu0  ;;  %791 = vst.msk [vmem:[%s1238_s29 + $0x6c] sm:$0xf] %vm763_vm1, %v1005_v13  ;;  %v601_v26 = vmax.f32 %v565_v15, 0.0  ;;  %v568_v28 = vadd.f32 %v1063_v24, %v1223_v18 }
 0x103   : > { %773 = vst.msk [vmem:[%s1238_s29 + $0x24] sm:$0xf] %vm763_vm1, %v987_v14  ;;  %v583_v27 = vmax.f32 %v493_v16, 0.0  ;;  %v496_v29 = vadd.f32 %v1223_v18, %v495_v25  ;;  %v559_v30 = vpop.f32.mrb[15].mxu1  ;;  %v617_v31 = vmin.f32 %v585_v21, 6.0  ;;  %v599_v32 = vmax.f32 %v557_v22, 0.0 }
 0x104   : > { %789 = vst.msk [vmem:[%s1238_s29 + $0x64] sm:$0xf] %vm763_vm1, %v1003_v20  ;;  %v586_v33 = vmax.f32 %v504_v23, 0.0  ;;  %v560_v34 = vadd.f32 %v1223_v18, %v559_v30  ;;  %v633_v35 = vmin.f32 %v601_v26, 6.0  ;;  %v602_v37 = vmax.f32 %v568_v28, 0.0 }
 0x105   : > { %v615_v36 = vmin.f32 %v583_v27, 6.0  ;;  %v584_v38 = vmax.f32 %v496_v29, 0.0  ;;  %v992_v39 = vpack.c.bf16 %v617_v31, %v617_v31  ;;  %v631_v40 = vmin.f32 %v599_v32, 6.0 }
 0x106   : > { %v618_v41 = vmin.f32 %v586_v33, 6.0  ;;  %v600_v42 = vmax.f32 %v560_v34, 0.0  ;;  %v1008_v43 = vpack.c.bf16 %v633_v35, %v633_v35  ;;  %v634_v45 = vmin.f32 %v602_v37, 6.0 }
 0x107   : > { %v990_v44 = vpack.c.bf16 %v615_v36, %v615_v36  ;;  %v616_v46 = vmin.f32 %v584_v38, 6.0  ;;  %778 = vst.msk [vmem:[%s1238_s29 + $0x38] sm:$0xf] %vm763_vm1, %v992_v39  ;;  %v1006_v18 = vpack.c.bf16 %v631_v40, %v631_v40 }
 0x108   : > { %v993_v47 = vpack.c.bf16 %v618_v41, %v618_v41  ;;  %v632_v48 = vmin.f32 %v600_v42, 6.0  ;;  %794 = vst.msk [vmem:[%s1238_s29 + $0x78] sm:$0xf] %vm763_vm1, %v1008_v43  ;;  %v1009_v49 = vpack.c.bf16 %v634_v45, %v634_v45 }
 0x109   : > { %776 = vst.msk [vmem:[%s1238_s29 + $0x30] sm:$0xf] %vm763_vm1, %v990_v44  ;;  %v991_v50 = vpack.c.bf16 %v616_v46, %v616_v46  ;;  %792 = vst.msk [vmem:[%s1238_s29 + $0x70] sm:$0xf] %vm763_vm1, %v1006_v18 }
 0x10a   : > { %779 = vst.msk [vmem:[%s1238_s29 + $0x3c] sm:$0xf] %vm763_vm1, %v993_v47  ;;  %v1007_v51 = vpack.c.bf16 %v632_v48, %v632_v48  ;;  %795 = vst.msk [vmem:[%s1238_s29 + $0x7c] sm:$0xf] %vm763_vm1, %v1009_v49 }
 0x10b   : > { %777 = vst.msk [vmem:[%s1238_s29 + $0x34] sm:$0xf] %vm763_vm1, %v991_v50 }
 0x10c   : > { %793 = vst.msk [vmem:[%s1238_s29 + $0x74] sm:$0xf] %vm763_vm1, %v1007_v51 }
 0x10d PF: > { %s13_s14 = sadd.s32 1, %s1132_s14   ;;  %s1341_s12 = smov %s1128_s13 }
 0x10e   : > { %p10_p5 = scmp.ge.s32.totalorder %s13_s14, 4   ;;  %s1342_s13 = smov %s1344_s15 }
 0x110   :  { %12 = sbr.rel (!%p10_p5) target bundleno = 2 (0x2), region = 68 }

</bundles_post_ra>
